<compile_context>
chip_gen: v7x
topology: tpu7x:2x2x1
jax: 0.10.0
libtpu: 0.0.40
codegen_flags: <defaults>
</compile_context>

<pallas_src>
import functools

import jax
import jax.numpy as jnp
from jax.experimental import pallas as pl
from jax.experimental.pallas import tpu as pltpu


def _round_up(x, m):
    return ((x + m - 1) // m) * m


def ffn_kernel(x_ref, w1_ref, b1_ref, w2_ref, b2_ref, o_ref, *, compute_dtype):
    """One (TM, E) row tile: Linear -> ReLU -> (Dropout = identity) -> Linear."""
    # Cast to the MXU compute dtype inside the kernel (no extra HBM pass).
    x = x_ref[...].astype(compute_dtype)

    # First matmul on the MXU with f32 accumulation; bias + ReLU epilogue in f32.
    h = jnp.dot(x, w1_ref[...], preferred_element_type=jnp.float32) + b1_ref[...]
    h = jnp.maximum(h, 0.0)  # ReLU
    # TODO(synk): training-mode dropout would need pltpu.prng_seed +
    # pltpu.prng_random_bits masking here; inference dropout is identity.

    out = jnp.dot(h.astype(compute_dtype), w2_ref[...],
                  preferred_element_type=jnp.float32) + b2_ref[...]
    o_ref[...] = out.astype(o_ref.dtype)


def transformer_ffn(x, w1, b1, w2, b2, *, compute_dtype=None, out_dtype=None, tm=512):
    """x: [batch, seq, emb]; w1/w2 stored as [in, out] (PyTorch weight.T); b1/b2 [emb].

    compute_dtype: MXU compute dtype (defaults to bf16 when x is f32; f32 accumulation
                   and f32 bias/ReLU epilogue either way).
    out_dtype:     output dtype (defaults to x.dtype; pass bf16 to halve writeback).
    """
    B, S, E = x.shape
    if compute_dtype is None:
        compute_dtype = jnp.bfloat16 if x.dtype == jnp.float32 else x.dtype
    compute_dtype = jnp.dtype(compute_dtype)
    if out_dtype is None:
        out_dtype = x.dtype
    out_dtype = jnp.dtype(out_dtype)

    M = B * S
    # Plain 2-D view of the activations: no padding, no cast, no extra HBM copy.
    # For E not a multiple of 128 we use full-extent feature blocks; Mosaic pads
    # the VMEM layout internally while HBM traffic stays exactly E-wide.
    x2d = x.reshape(M, E)
    # Weights/biases are tiny relative to activations: cast once in the wrapper
    # (halves weight DMA + resident VMEM on the bf16 path); biases stay f32.
    w1c = w1.astype(compute_dtype)
    w2c = w2.astype(compute_dtype)
    b1r = b1.astype(jnp.float32).reshape(1, E)
    b2r = b2.astype(jnp.float32).reshape(1, E)
    # TODO(synk): optional fp8 weight path (v7x MXU) with per-output-channel
    # scales applied in the f32 epilogue.

    x_bytes = x2d.dtype.itemsize
    o_bytes = out_dtype.itemsize
    w_bytes = compute_dtype.itemsize

    # --- Row-tile size -------------------------------------------------------
    # Multiple of 8 (sublane), and small enough that the grid has >= 4 steps
    # when M allows it (pipelining + dual-TensorCore sharding on v7x).
    if M <= 8:
        TM = M
    else:
        TM = min(tm, _round_up(pl.cdiv(M, 4), 8))
        TM = max(8, _round_up(min(TM, M), 8))

    # --- VMEM budget -----------------------------------------------------------
    try:
        vmem_capacity = int(pltpu.get_tpu_info().vmem_capacity_bytes)
    except Exception:
        vmem_capacity = 64 << 20  # conservative: valid on v5e/v6e/v7x alike
    vmem_usable = int(0.8 * vmem_capacity)  # headroom for compiler scratch / sems

    act_buffers = 3 if E <= 512 else None  # deepen pipeline in the DMA-bound regime
    n_act = act_buffers if act_buffers is not None else 2

    def _vmem_needed(tile_m):
        return int(
            2 * 2 * E * E * w_bytes          # W1, W2 (counted double-buffered for safety)
            + 2 * 2 * E * 4                  # biases
            + n_act * tile_m * E * x_bytes   # pipelined input tiles
            + n_act * tile_m * E * o_bytes   # pipelined output tiles
            + 3 * tile_m * E * 4             # f32 intermediates in flight
            + (2 << 20)                      # slack
        )

    # Shrink the row tile if the budget would not fit (matters on v7x's 64 MiB).
    while M > 8 and TM > 8 and _vmem_needed(TM) > vmem_usable:
        TM = max(8, _round_up(TM // 2, 8))
    # TODO(synk): if 2*E*E*w_bytes alone exceeds usable VMEM (very large E on v7x),
    # a column-tiled 2-D grid (or fp8 weights) is needed instead of resident weights.

    vmem_limit = min(max(_vmem_needed(TM), 32 << 20), vmem_usable)

    grid = (pl.cdiv(M, TM),)  # ragged M tail handled by Pallas block padding/masking

    cost = pl.CostEstimate(
        flops=4 * M * E * E,  # two matmuls
        transcendentals=0,
        bytes_accessed=M * E * (x_bytes + o_bytes) + 2 * E * E * w_bytes + 2 * E * 4,
    )

    kernel = functools.partial(ffn_kernel, compute_dtype=compute_dtype)

    def build_specs(use_buffer_hints):
        def spec(shape, index_map, buffers):
            if use_buffer_hints and buffers is not None:
                return pl.BlockSpec(shape, index_map,
                                    pipeline_mode=pl.Buffered(buffers))
            return pl.BlockSpec(shape, index_map)

        in_specs = [
            spec((TM, E), lambda i: (i, 0), act_buffers),  # x tile (pipelined)
            spec((E, E), lambda i: (0, 0), 1),             # W1 resident, single-buffered
            spec((1, E), lambda i: (0, 0), 1),             # b1 resident
            spec((E, E), lambda i: (0, 0), 1),             # W2 resident
            spec((1, E), lambda i: (0, 0), 1),             # b2 resident
        ]
        out_spec = spec((TM, E), lambda i: (i, 0), act_buffers)
        return in_specs, out_spec

    def run(use_buffer_hints):
        in_specs, out_spec = build_specs(use_buffer_hints)
        return pl.pallas_call(
            kernel,
            out_shape=jax.ShapeDtypeStruct((M, E), out_dtype),
            grid=grid,
            in_specs=in_specs,
            out_specs=out_spec,
            compiler_params=pltpu.CompilerParams(
                dimension_semantics=("parallel",),  # independent row tiles
                vmem_limit_bytes=vmem_limit,
            ),
            cost_estimate=cost,
        )(x2d, w1c, b1r, w2c, b2r)

    try:
        out2d = run(True)
    except Exception:
        # pipeline_mode / pl.Buffered hints unsupported on this JAX/Mosaic version;
        # fall back to default double-buffering (identical semantics).
        out2d = run(False)

    return out2d.reshape(B, S, E)


def init_linear_params(key, in_features, out_features, dtype=jnp.float32):
    """Deterministic PyTorch-style Linear init: U(-1/sqrt(in), 1/sqrt(in))."""
    k_w, k_b = jax.random.split(key)
    bound = 1.0 / (in_features ** 0.5)
    # Stored as [in, out] (PyTorch weight.T) so the kernel can do x @ W.
    w = jax.random.uniform(k_w, (in_features, out_features), dtype,
                           minval=-bound, maxval=bound)
    b = jax.random.uniform(k_b, (out_features,), dtype,
                           minval=-bound, maxval=bound)
    return w, b


if __name__ == "__main__":
    emb_size = 32
    batch, seq = 2, 8

    key = jax.random.PRNGKey(0)
    k_x, k_l1, k_l2 = jax.random.split(key, 3)

    x = jax.random.normal(k_x, (batch, seq, emb_size), dtype=jnp.float32)
    w1, b1 = init_linear_params(k_l1, emb_size, emb_size)
    w2, b2 = init_linear_params(k_l2, emb_size, emb_size)

    # Plain-JAX reference (inference-mode dropout = identity).
    ref = jnp.maximum(x @ w1 + b1, 0.0) @ w2 + b2

    # Strict f32 path.
    out_f32 = jax.block_until_ready(
        transformer_ffn(x, w1, b1, w2, b2, compute_dtype=jnp.float32))
    assert out_f32.shape == (batch, seq, emb_size)
    assert jnp.allclose(out_f32, ref, atol=1e-4, rtol=1e-4)

    # Default path: bf16 MXU compute with f32 accumulation (looser tolerance).
    out = jax.block_until_ready(transformer_ffn(x, w1, b1, w2, b2))
    assert out.shape == (batch, seq, emb_size)
    assert jnp.allclose(out, ref, atol=5e-2, rtol=5e-2)

    print("KERNEL_OK")
</pallas_src>

<mosaic_0001>
module attributes {stable_mosaic.version = 11 : i64} {
  func.func @ffn_kernel(%arg0: i32, %arg1: memref<8x32xf32, #tpu.memory_space<vmem>>, %arg2: memref<32x32xf32, #tpu.memory_space<vmem>>, %arg3: memref<1x32xf32, #tpu.memory_space<vmem>>, %arg4: memref<32x32xf32, #tpu.memory_space<vmem>>, %arg5: memref<1x32xf32, #tpu.memory_space<vmem>>, %arg6: memref<8x32xf32, #tpu.memory_space<vmem>>) attributes {dimension_semantics = [#tpu.dimension_semantics<parallel>], iteration_bounds = array<i64: 2>, scalar_prefetch = 0 : i64, scratch_operands = 0 : i64, tpu.core_type = #tpu.core_type<tc>, window_params = [{transform_indices = @transform_0, window_bounds = array<i64: 8, 32>}, {pipeline_mode = #tpu.pipeline_mode<synchronous>, transform_indices = @transform_1, window_bounds = array<i64: 32, 32>}, {pipeline_mode = #tpu.pipeline_mode<synchronous>, transform_indices = @transform_2, window_bounds = array<i64: 1, 32>}, {pipeline_mode = #tpu.pipeline_mode<synchronous>, transform_indices = @transform_3, window_bounds = array<i64: 32, 32>}, {pipeline_mode = #tpu.pipeline_mode<synchronous>, transform_indices = @transform_4, window_bounds = array<i64: 1, 32>}, {transform_indices = @transform_5, window_bounds = array<i64: 8, 32>}]} {
    %c0 = arith.constant 0 : index
    %c0_0 = arith.constant 0 : index
    %0 = vector.load %arg1[%c0, %c0_0] : memref<8x32xf32, #tpu.memory_space<vmem>>, vector<8x32xf32>
    %c0_1 = arith.constant 0 : index
    %c0_2 = arith.constant 0 : index
    %1 = vector.load %arg2[%c0_1, %c0_2] : memref<32x32xf32, #tpu.memory_space<vmem>>, vector<32x32xf32>
    %cst = arith.constant dense<0.000000e+00> : vector<8x32xf32>
    %2 = tpu.matmul %0, %1, %cst {dimension_numbers = #tpu.dot_dimension_numbers<[1], [0], [0], [1], [0, 0, 1, 1], [], []>} : vector<8x32xf32>, vector<32x32xf32>, vector<8x32xf32> -> vector<8x32xf32>
    %c0_3 = arith.constant 0 : index
    %c0_4 = arith.constant 0 : index
    %3 = vector.load %arg3[%c0_3, %c0_4] : memref<1x32xf32, #tpu.memory_space<vmem>>, vector<1x32xf32>
    %4 = vector.broadcast %3 : vector<1x32xf32> to vector<8x32xf32>
    %5 = arith.addf %2, %4 : vector<8x32xf32>
    %cst_5 = arith.constant 0.000000e+00 : f32
    %6 = vector.broadcast %cst_5 : f32 to vector<8x32xf32>
    %7 = arith.maximumf %5, %6 : vector<8x32xf32>
    %c0_6 = arith.constant 0 : index
    %c0_7 = arith.constant 0 : index
    %8 = vector.load %arg4[%c0_6, %c0_7] : memref<32x32xf32, #tpu.memory_space<vmem>>, vector<32x32xf32>
    %cst_8 = arith.constant dense<0.000000e+00> : vector<8x32xf32>
    %9 = tpu.matmul %7, %8, %cst_8 {dimension_numbers = #tpu.dot_dimension_numbers<[1], [0], [0], [1], [0, 0, 1, 1], [], []>} : vector<8x32xf32>, vector<32x32xf32>, vector<8x32xf32> -> vector<8x32xf32>
    %c0_9 = arith.constant 0 : index
    %c0_10 = arith.constant 0 : index
    %10 = vector.load %arg5[%c0_9, %c0_10] : memref<1x32xf32, #tpu.memory_space<vmem>>, vector<1x32xf32>
    %11 = vector.broadcast %10 : vector<1x32xf32> to vector<8x32xf32>
    %12 = arith.addf %9, %11 : vector<8x32xf32>
    %c0_11 = arith.constant 0 : index
    %c0_12 = arith.constant 0 : index
    %13 = vector.load %arg6[%c0_11, %c0_12] : memref<8x32xf32, #tpu.memory_space<vmem>>, vector<8x32xf32>
    tpu.vector_store %arg6[%c0_11, %c0_12], %12 {strides = array<i32>} : memref<8x32xf32, #tpu.memory_space<vmem>>, vector<8x32xf32>,
    return
  }
  func.func @transform_0(%arg0: i32) -> (i32, i32) {
    %c0_i32 = arith.constant 0 : i32
    %c0_i32_0 = arith.constant 0 : i32
    return %arg0, %c0_i32 : i32, i32
  }
  func.func @transform_1(%arg0: i32) -> (i32, i32) {
    %c0_i32 = arith.constant 0 : i32
    %c0_i32_0 = arith.constant 0 : i32
    %c0_i32_1 = arith.constant 0 : i32
    return %c0_i32, %c0_i32_0 : i32, i32
  }
  func.func @transform_2(%arg0: i32) -> (i32, i32) {
    %c0_i32 = arith.constant 0 : i32
    %c0_i32_0 = arith.constant 0 : i32
    %c0_i32_1 = arith.constant 0 : i32
    return %c0_i32, %c0_i32_0 : i32, i32
  }
  func.func @transform_3(%arg0: i32) -> (i32, i32) {
    %c0_i32 = arith.constant 0 : i32
    %c0_i32_0 = arith.constant 0 : i32
    %c0_i32_1 = arith.constant 0 : i32
    return %c0_i32, %c0_i32_0 : i32, i32
  }
  func.func @transform_4(%arg0: i32) -> (i32, i32) {
    %c0_i32 = arith.constant 0 : i32
    %c0_i32_0 = arith.constant 0 : i32
    %c0_i32_1 = arith.constant 0 : i32
    return %c0_i32, %c0_i32_0 : i32, i32
  }
  func.func @transform_5(%arg0: i32) -> (i32, i32) {
    %c0_i32 = arith.constant 0 : i32
    %c0_i32_0 = arith.constant 0 : i32
    return %arg0, %c0_i32 : i32, i32
  }
}

</mosaic_0001>

<bundles_post_ra>
// kernel: tpu_custom_call.1
= control target key start
LH: loop header
LB: loop body
LE: loop exit
PB: predicated region body
PF: predicated region fallthrough
CT: control target
= control target key end

     0   :  { %10 = vsyncpa [#allocation3], 0  ;;  %s1119_s0 = inlined_call_operand.hbm [shape: f32[16,32], index: 0, kind: input, shape index: {}]   ;;  %s1120_s1 = inlined_call_operand.hbm [shape: f32[32,32], index: 1, kind: input, shape index: {}]   ;;  %s1121_s2 = inlined_call_operand.vmem [shape: f32[1,32], index: 2, kind: input, shape index: {}]   ;;  %s1122_s3 = inlined_call_operand.hbm [shape: f32[32,32], index: 3, kind: input, shape index: {}]   ;;  %s1123_s4 = inlined_call_operand.vmem [shape: f32[1,32], index: 4, kind: input, shape index: {}]   ;;  %s1124_s5 = inlined_call_operand.hbm [shape: f32[16,32], index: 5, kind: output, shape index: {}]  }
   0x1   :  { %12 = vsyncpa [#allocation3 + $0x1], 0 }
   0x2   :  { %13 = vsyncpa [#allocation6], 0 }
   0x3   :  { %14 = vsyncpa [#allocation4], 0 }
   0x4   :  { %16 = vsyncpa [#allocation4 + $0x1], 0  ;;  %s877_s18 = smov 0   ;;  %s879_s19 = smov 0  }
   0x5   :  { %s881_s20 = smov 0   ;;  %s883_s21 = smov 0  }
   0x6 LB: > { %s898_s22 = sadd.s32 4294967295, %s836_s21   ;;  %s544_s23 = sadd.s32 4294967294, %s836_s21   ;;  %s836_s21 = sphi %s883_s21, %s1144_s21   ;;  %s832_s20 = sphi %s881_s20, %s1143_s20   ;;  %s828_s19 = sphi %s879_s19, %s1142_s19   ;;  %s824_s18 = sphi %s877_s18, %s1141_s18  }
   0x7   : > { %p42_p0 = scmp.ne.s32.totalorder %s828_s19, %s824_s18  ;;  %p1125_p1 = scmp.eq.s32.totalorder %s898_s22, 0 }
   0x8   : > { %p156_p3 = scmp.eq.s32.totalorder %s544_s23, 1  ;;  %p545_p5 = scmp.ge.s32.totalorder %s836_s21, 1 }
   0x9   : > { %p907_p4 = por %p1125_p1, %p42_p0  ;;  %p163_p7 = scmp.lt.s32.totalorder %s836_s21, 3 }
   0xa   : > { %p912_p6 = por %p156_p3, %p42_p0  ;;  %s838_s27 = smov [#allocation5]  }
   0xb   : > { %s1128_s24 = scalar_select %p907_p4, 1, 0 }
   0xc   : > { %s1129_s25 = scalar_select %p912_p6, 1, 0 }
   0xd   : > { %p917_p8 = pnand %p545_p5, %p163_p7  ;;  %s175_s28 = sshll.u32 %s838_s27, 4  ;;  %s921_s28 = int_to_ptr.vmem [resolvable:$true] %s175_s28 }
   0xe   : > { %s839_s30 = smov [#allocation7]   ;;  %s680_s9 = scalar_lea.hbm %s1120_s1, 512 }
   0xf   : > { %p620_p9 = pneg %p917_p8  ;;  %s191_s6 = sshll.u32 %s839_s30, 4  ;;  %s932_s6 = int_to_ptr.vmem [resolvable:$true] %s191_s6 }
  0x10   : > { %p681_p12 = scmp.ne.s32.totalorder %s1120_s1, %s680_s9  ;;  %p687_p5 = scmp.lt.u32.totalorder %s680_s9, %s1120_s1 }
  0x11   : > { %p928_p11 = pnand %p620_p9, %p1125_p1 }
  0x13   : > { %p682_p13 = pneg %p928_p11 }
  0x15   : > { %p683_p0 = pnand %p682_p13, %p681_p12 }
  0x17   : > { %p684_p3 = pneg %p683_p0 }
  0x19   : > { %p689_p7 = pnand %p687_p5, %p684_p3 }
  0x1b   : > { %692 = shalt.err (!%p689_p7)
}
  0x1c   : > { %s693_s14 = scalar_lea.vmem %s921_s28, 512  ;;  %p701_p2 = scmp.lt.s32.totalorder %s921_s28, %s921_s28 }
  0x1d   : > { %p694_p9 = scmp.ne.s32.totalorder %s921_s28, %s693_s14  ;;  %p702_p12 = scmp.lt.s32.totalorder %s693_s14, %s693_s14 }
  0x1f   : > { %p696_p10 = pnand %p694_p9, %p682_p13  ;;  %p703_p0 = por %p702_p12, %p701_p2 }
  0x21   : > { %p697_p1 = pneg %p696_p10 }
  0x23   : > { %p704_p6 = pnand %p703_p0, %p697_p1 }
  0x25   : > { %707 = shalt.err (!%p704_p6)
}
  0x26   : > { %s840_s15 = smov 128   ;;  %s841_s16 = smov 8  }
  0x27   : > { %623 = dma.hbm_to_vmem [thread:$0]  (!%p928_p11), %s1120_s1, 512, %s921_s28, [#allocation6], %s840_s15, %s840_s15, %s841_s16  }
  0x28   : > { %s708_s7 = scalar_lea.hbm %s1122_s3, 512 }
  0x29   : > { %p709_p2 = scmp.ne.s32.totalorder %s1122_s3, %s708_s7  ;;  %p715_p10 = scmp.lt.u32.totalorder %s708_s7, %s1122_s3 }
  0x2b   : > { %p711_p1 = pnand %p709_p2, %p682_p13 }
  0x2d   : > { %p712_p6 = pneg %p711_p1 }
  0x2f   : > { %p717_p3 = pnand %p715_p10, %p712_p6 }
  0x31   : > { %720 = shalt.err (!%p717_p3)
}
  0x32   : > { %s721_s28 = scalar_lea.vmem %s932_s6, 512  ;;  %p729_p12 = scmp.lt.s32.totalorder %s932_s6, %s932_s6 }
  0x33   : > { %p722_p5 = scmp.ne.s32.totalorder %s932_s6, %s721_s28  ;;  %p730_p0 = scmp.lt.s32.totalorder %s721_s28, %s721_s28 }
  0x35   : > { %p724_p7 = pnand %p722_p5, %p682_p13  ;;  %p731_p2 = por %p730_p0, %p729_p12 }
  0x37   : > { %p725_p9 = pneg %p724_p7 }
  0x39   : > { %p732_p1 = pnand %p731_p2, %p725_p9 }
  0x3b   : > { %735 = shalt.err (!%p732_p1)
}
  0x3c   : > { %626 = dma.hbm_to_vmem [thread:$0]  (!%p928_p11), %s1122_s3, 512, %s932_s6, [#allocation6], %s840_s15, %s840_s15, %s841_s16  }
  0x3d   : > { %s987_s14 = sadd.s32 1, %s836_s21   ;;  %s29_s29 = sadd.s32 1, %s832_s20 }
  0x3e   : > { %s26_s17 = ssub.s32 %s836_s21, %s987_s14  ;;  %p36_p13 = scmp.ne.s32.totalorder %s832_s20, %s828_s19 }
  0x3f   : > { %p27_p6 = scmp.eq.s32.totalorder %s26_s17, 0  ;;  %p37_p10 = scmp.eq.s32.totalorder %s836_s21, 0 }
  0x40   : > { %p1132_p3 = scmp.eq.s32.totalorder %s898_s22, 1  ;;  %p637_p7 = scmp.lt.s32.totalorder %s836_s21, 2 }
  0x41   : > { %s1003_s27 = scalar_select %p27_p6, %s832_s20, %s29_s29  }
  0x42   : > { %p997_p5 = por %p1132_p3, %p36_p13  ;;  %p38_p9 = por %p37_p10, %p36_p13 }
  0x43   : > { %s208_s30 = sand.u32 1, %s832_s20   ;;  %s550_s6 = sshll.u32 %s836_s21, 7 }
  0x44   : > { %s1133_s23 = scalar_select %p997_p5, 1, 0 }
  0x45   : > { %s549_s7 = sshll.u32 %s208_s30, 3  ;;  %s1010_s8 = scalar_lea.hbm %s1119_s0, %s550_s6 }
  0x46   : > { %s212_s9 = scalar_lea.vmem [#allocation2], %s549_s7  ;;  %p1014_p11 = pnand %p637_p7, %p38_p9 }
  0x47   : > { %s219_s10 = sshll.u32 %s212_s9, 4  ;;  %s209_s28 = scalar_lea.sflag [#allocation3], %s208_s30  ;;  %s1012_s10 = int_to_ptr.vmem [resolvable:$true] %s219_s10 }
  0x48   : > { %s736_s12 = scalar_lea.hbm %s1010_s8, 128  ;;  %p738_p0 = pneg %p1014_p11 }
  0x49   : > { %p737_p12 = scmp.ne.s32.totalorder %s1010_s8, %s736_s12  ;;  %s741_s17 = scalar_lea.hbm %s1119_s0, 256 }
  0x4a   : > { %p742_p13 = scmp.lt.u32.totalorder %s1010_s8, %s1119_s0  ;;  %p743_p6 = scmp.lt.u32.totalorder %s741_s17, %s736_s12 }
  0x4b   : > { %p739_p2 = pnand %p738_p0, %p737_p12  ;;  %p745_p3 = scmp.lt.u32.totalorder %s736_s12, %s1010_s8 }
  0x4c   : > { %p744_p10 = por %p743_p6, %p742_p13 }
  0x4d   : > { %p740_p1 = pneg %p739_p2 }
  0x4e   : > { %p746_p7 = por %p745_p3, %p744_p10 }
  0x50   : > { %p747_p9 = pnand %p746_p7, %p740_p1 }
  0x52   : > { %750 = shalt.err (!%p747_p9)
}
  0x53   : > { %s751_s30 = scalar_lea.vmem %s1012_s10, 128  ;;  %s842_s15 = smov [#allocation2]  }
  0x54   : > { %p752_p12 = scmp.ne.s32.totalorder %s1012_s10, %s751_s30  ;;  %s756_s16 = sshll.u32 %s842_s15, 4  ;;  %s757_s16 = int_to_ptr.vmem [resolvable:$false] %s756_s16 }
  0x55   : > { %s758_s9 = scalar_lea.vmem %s757_s16, 256  ;;  %p759_p4 = scmp.lt.s32.totalorder %s1012_s10, %s757_s16 }
  0x56   : > { %p754_p2 = pnand %p752_p12, %p738_p0  ;;  %p760_p13 = scmp.lt.s32.totalorder %s758_s9, %s751_s30 }
  0x58   : > { %p755_p5 = pneg %p754_p2  ;;  %p761_p6 = por %p760_p13, %p759_p4 }
  0x5a   : > { %p762_p10 = pnand %p761_p6, %p755_p5 }
  0x5c   : > { %765 = shalt.err (!%p762_p10)
}
  0x5d   : > { %630 = dma.hbm_to_vmem [thread:$0]  (!%p1014_p11), %s1010_s8, 128, %s1012_s10, %s209_s28  }
  0x5e   : > { %228 = sbr.rel (%p917_p8) target bundleno = 559 (0x22f), region = 40  ;;  %s1046_s12 = sand.u32 (!%p917_p8), 1, %s828_s19  }
  0x5f   : > { %s552_s13 = sshll.u32 (!%p917_p8), %s1046_s12, 3  ;;  %s231_s29 = scalar_lea.sflag (!%p917_p8), [#allocation3], %s1046_s12 }
  0x60   : > { %s234_s17 = scalar_lea.vmem (!%p917_p8), [#allocation2], %s552_s13  ;;  %p1135_p4 = scmp.ne.s32.totalorder (!%p917_p8), %s1128_s24, 0 }
  0x65   : > { %811 = dma.done.wait (%p1135_p4), %s231_s29, 128  }
  0x66   : > { %813 = vsyncadd (%p1135_p4), %s231_s29, 4294967168  ;;  %p1136_p5 = scmp.eq.s32.totalorder %s898_s22, 0 }
  0x68   : > { %815 = dma.done.wait (%p1136_p5), [#allocation6], 1024   ;;  %p1137_p8 = pmov %p1136_p5 }
  0x69   : > { %v843_v0 = vmov 0.0|0.0   ;;  %vm844_vm0 = vmmov 0   ;;  %v845_v1 = vmov 0.0   ;;  %v270_v2 = vld [vmem:[#allocation5] sm:$0xff]  ;;  %v271_v3 = vld [vmem:[#allocation5 + $0x8] sm:$0xff]  ;;  %v272_v4 = vld [vmem:[#allocation5 + $0x10] sm:$0xff] }
  0x6a   : > { %817 = vsyncadd (%p1137_p8), [#allocation6], 4294966272  ;;  %596 = vmatprep.subr.bf16.mxu0 %v843_v0  ;;  %582 = vmatprep.mubr.msk.f32.mxu0 %vm844_vm0, %v845_v1  ;;  %v597_v5 = vpack.c.bf16 %v271_v3, %v270_v2  ;;  %v273_v6 = vld [vmem:[#allocation5 + $0x18] sm:$0xff]  ;;  %v356_v7 = vld [vmem:[#allocation7] sm:$0xff]  ;;  %vm281_vm1 = vcmask 261120   ;;  %s561_s11 = sshll.u32 %s898_s22, 7 }
  0x6b   : > { %602 = vmatprep.subr.bf16.mxu1 %v843_v0  ;;  %593 = vmatprep.mubr.msk.f32.mxu1 %vm844_vm0, %v845_v1  ;;  %v357_v8 = vld [vmem:[#allocation7 + $0x8] sm:$0xff]  ;;  %v600_v9 = vpack.c.bf16 %v273_v6, %v272_v4  ;;  %v269_v11 = vld [vmem:[%s234_s17] sm:$0xff]  ;;  %s268_s28 = scalar_lea.vmem [#allocation8], %s552_s13  ;;  %s1074_s15 = scalar_lea.hbm %s1124_s5, %s561_s11 }
  0x6c   : > { %598 = vmatpush3.bf16.msra.mxu0 %v597_v5  ;;  %v603_v10 = vpack.c.bf16 %v357_v8, %v356_v7  ;;  %v358_v12 = vld [vmem:[#allocation7 + $0x10] sm:$0xff]  ;;  %v359_v13 = vld [vmem:[#allocation7 + $0x18] sm:$0xff]  ;;  %s455_s7 = sshll.u32 %s268_s28, 4  ;;  %s442_s16 = scalar_lea.sflag [#allocation4], %s1046_s12  ;;  %s1076_s7 = int_to_ptr.vmem [resolvable:$true] %s455_s7 }
  0x6d   : > { %599 = vmatprep.subr.bf16.mxu0 %v843_v0  ;;  %v606_v14 = vpack.c.bf16 %v359_v13, %v358_v12  ;;  %v556_v15 = vld [vmem:[%s1121_s2] ss:$0 sm:$0xff]  ;;  %s766_s22 = scalar_lea.vmem %s1076_s7, 128  ;;  %p1138_p0 = scmp.ne.s32.totalorder %s1133_s23, 0 }
  0x6e   : > { %604 = vmatpush3.bf16.msra.mxu1 %v603_v10  ;;  %v558_v20 = vld [vmem:[%s1123_s4] ss:$0 sm:$0xff]  ;;  %p767_p11 = scmp.ne.s32.totalorder %s1076_s7, %s766_s22  ;;  %s846_s9 = smov [#allocation8]  }
  0x6f   : > { %605 = vmatprep.subr.bf16.mxu1 %v843_v0  ;;  %s770_s13 = sshll.u32 %s846_s9, 4  ;;  %s771_s13 = int_to_ptr.vmem [resolvable:$false] %s770_s13 }
  0x70   : > { %601 = vmatpush3.bf16.msra.mxu0 %v600_v9  ;;  %p768_p1 = pnand %p767_p11, %p1138_p0  ;;  %s772_s29 = scalar_lea.vmem %s771_s13, 256 }
  0x71   : > { %p773_p7 = scmp.lt.s32.totalorder %s1076_s7, %s771_s13  ;;  %p774_p9 = scmp.lt.s32.totalorder %s772_s29, %s766_s22 }
  0x72   : > { %607 = vmatpush3.bf16.msra.mxu1 %v606_v14  ;;  %p769_p3 = pneg %p768_p1 }
  0x73   : > { %583 = vmatmul.mubr.msk.f32.vlgmr.msra.gmra.mrb[0].mxu0 %vm281_vm1, %v269_v11  ;;  %p775_p12 = por %p774_p9, %p773_p7 }
  0x75   : > { %p776_p2 = pnand %p775_p12, %p769_p3 }
 0x146   : > { %v351_v16 = vpop.f32.mrb[0].mxu0 }
 0x147   : > { %v352_v17 = vadd.f32 %v556_v15, %v351_v16  ;;  %v584_v18 = vpop.f32.mrb[1].mxu0 }
 0x149   : > { %v355_v19 = vmax.f32 %v352_v17, 0.0 }
 0x14b   : > { %594 = vmatmul.mubr.msk.f32.vlgmr.msra.gmra.mrb[0].mxu1 %vm281_vm1, %v355_v19 }
 0x21e   : > { %v436_v21 = vpop.f32.mrb[0].mxu1 }
 0x21f   : > { %v437_v22 = vadd.f32 %v558_v20, %v436_v21  ;;  %v595_v23 = vpop.f32.mrb[1].mxu1 }
 0x221   : > { %440 = vst.msk [vmem:[%s268_s28] sm:$0xff] %vm281_vm1, %v437_v22 }
 0x222   : > { %779 = shalt.err (!%p776_p2)
}
 0x223   : > { %s780_s12 = scalar_lea.hbm %s1074_s15, 128  ;;  %s784_s26 = scalar_lea.hbm %s1124_s5, 256 }
 0x224   : > { %p781_p13 = scmp.ne.s32.totalorder %s1074_s15, %s780_s12  ;;  %p785_p4 = scmp.lt.u32.totalorder %s1074_s15, %s1124_s5 }
 0x225   : > { %p786_p5 = scmp.lt.u32.totalorder %s784_s26, %s780_s12  ;;  %p788_p11 = scmp.lt.u32.totalorder %s780_s12, %s1074_s15 }
 0x226   : > { %p782_p6 = pnand %p781_p13, %p1138_p0 }
 0x227   : > { %p787_p8 = por %p786_p5, %p785_p4 }
 0x228   : > { %p783_p10 = pneg %p782_p6 }
 0x229   : > { %p789_p1 = por %p788_p11, %p787_p8 }
 0x22b   : > { %p790_p3 = pnand %p789_p1, %p783_p10 }
 0x22d   : > { %793 = shalt.err (!%p790_p3)
}
 0x22e   : > { %618 = dma.vmem_to_hbm [thread:$0]  (%p1138_p0), %s1076_s7, 128, %s1074_s15, %s442_s16  }
 0x22f PF: > { %s467_s11 = sand.u32 1, %s824_s18   ;;  %p1139_p7 = scmp.ne.s32.totalorder %s1129_s25, 0 }
 0x230   : > { %p1140_p9 = scmp.ge.s32.totalorder %s836_s21, 2  ;;  %s468_s28 = scalar_lea.sflag [#allocation4], %s467_s11 }
 0x232   : > { %p632_p12 = pnand %p1140_p9, %p1139_p7 }
 0x234   : > { %819 = dma.done.wait (!%p632_p12), %s468_s28, 128  }
 0x235   : > { %821 = vsyncadd (!%p632_p12), %s468_s28, 4294967168  ;;  %p19_p2 = scmp.ge.s32.totalorder %s987_s14, 4   ;;  %s1141_s18 = smov %s828_s19 }
 0x236   : > { %s1142_s19 = smov %s832_s20  ;;  %s1143_s20 = smov %s1003_s27 }
 0x237   : > { %s1144_s21 = smov %s987_s14  ;;  %21 = sbr.rel (!%p19_p2) target bundleno = 6 (0x6), region = 93 }
 0x23e   :  { %473 = vsyncpa [#allocation3], 1 }
 0x23f   :  { %475 = vsyncpa [#allocation3 + $0x1], 1 }
 0x240   :  { %476 = vsyncpa [#allocation6], 1 }
 0x241   :  { %477 = vsyncpa [#allocation4], 1 }
 0x242   :  { %479 = vsyncpa [#allocation4 + $0x1], 1 }

</bundles_post_ra>
